<compile_context>
chip_gen: v5e
topology: v5e:2x2
jax: 0.10.0
libtpu: 0.0.40
codegen_flags: <defaults>
</compile_context>

<pallas_src>
import math

import jax
import jax.numpy as jnp
from jax.experimental import pallas as pl
from jax.experimental.pallas import tpu as pltpu


# ~4 MiB per x block: measured sweet spot (~85% of HBM roofline) on v5e/v6e, and
# (x block + out block) * 2 pipeline buffers stays well under v7x's 64 MiB VMEM.
_BLOCK_BYTE_BUDGET = 4 * 1024 * 1024
_VMEM_LIMIT_BYTES = 32 * 1024 * 1024


def _drop_path_kernel(x_ref, scale_ref, o_ref):
    """x_ref: (BN, TD) tile; scale_ref: (BN, 1) f32 per-row scale; o_ref: (BN, TD)."""
    o_ref[...] = (x_ref[...] * scale_ref[...]).astype(o_ref.dtype)


def _sublane_pack(itemsize: int) -> int:
    # Rows per packed vreg: 8 for 4-byte, 16 for 2-byte, 32 for 1-byte dtypes.
    return 8 * max(1, 4 // itemsize)


def _pick_tiles(nr, d, itemsize, byte_budget):
    """Byte-budget tile picker: dtype-packed row tile, 128-multiple lane tile."""
    pack = _sublane_pack(itemsize)
    budget_elems = max(byte_budget // itemsize, pack * 128)

    bn = nr if nr <= pack else pack                  # full dim or multiple of packing
    td_budget = max(budget_elems // bn, 128)
    if d <= td_budget:
        td = d                                       # full lane dim (always legal)
        if nr > pack:
            # Grow the row tile (in multiples of the packing) to fill the byte budget.
            bn_budget = max(pack, (budget_elems // d) // pack * pack)
            bn = min(bn_budget, -(-nr // pack) * pack)
    else:
        td = (td_budget // 128) * 128                # multiple of 128

    # v7x has two TensorCores: give a big single-block tensor >= 2 parallel grid steps.
    if pl.cdiv(nr, bn) * pl.cdiv(d, td) == 1 and nr * d * itemsize > (1 << 20):
        if d >= 256:
            td = max(128, (d // 2) // 128 * 128)
        elif nr >= 2 * pack:
            bn = max(pack, (nr // 2) // pack * pack)
    return bn, td


def drop_path(x, drop_prob: float = 0.0, *, training: bool = False, key=None,
              byte_budget: int = _BLOCK_BYTE_BUDGET, donate: bool = False):
    """Pallas forward of DropPath. Matches torch drop_path(x, drop_prob, training)."""
    if drop_prob == 0.0 or not training:
        return x
    if key is None:
        raise ValueError("key is required when training with drop_prob > 0")

    keep_prob = 1.0 - drop_prob
    n = x.shape[0]
    d = 1
    for s in x.shape[1:]:
        d *= s

    # Per-sample Bernoulli(keep_prob) mask, same formula as torch, drawn and scaled in
    # float32 so the 1/keep_prob factor is never rounded in a low-precision dtype.
    u = jax.random.uniform(key, (n,), dtype=jnp.float32)
    scale = jnp.floor(keep_prob + u) / keep_prob               # 0.0 or 1/keep_prob (f32)

    itemsize = jnp.dtype(x.dtype).itemsize
    pack = _sublane_pack(itemsize)

    # Lane-dense flat view (rows, lanes).  If N is not a multiple of the sublane
    # packing, fold features into rows: (N, D) -> (N*k, D/k) with the per-sample scale
    # repeated k times.  Semantics preserving (scale is constant per sample) and keeps
    # packed vregs full / stores unmasked.
    nr, dr, scale_rows = n, d, scale.reshape(n, 1)
    if n % pack != 0:
        k = pack // math.gcd(n, pack)
        if k > 1 and d % k == 0:
            nr, dr = n * k, d // k
            scale_rows = jnp.repeat(scale.reshape(n, 1), k, axis=0)
    x2 = x.reshape(nr, dr)

    bn, td = _pick_tiles(nr, dr, itemsize, byte_budget)
    grid = (pl.cdiv(nr, bn), pl.cdiv(dr, td))

    out2 = pl.pallas_call(
        _drop_path_kernel,
        out_shape=jax.ShapeDtypeStruct((nr, dr), x.dtype),
        grid_spec=pltpu.PrefetchScalarGridSpec(
            num_scalar_prefetch=0,
            grid=grid,
            in_specs=[
                pl.BlockSpec((bn, td), lambda i, j: (i, j)),   # x tile
                pl.BlockSpec((bn, 1), lambda i, j: (i, 0)),    # per-row scale (f32), reused across j
            ],
            out_specs=pl.BlockSpec((bn, td), lambda i, j: (i, j)),
        ),
        compiler_params=pltpu.CompilerParams(
            dimension_semantics=("parallel", "parallel"),
            vmem_limit_bytes=_VMEM_LIMIT_BYTES),
        input_output_aliases=({0: 0} if donate else {}),
    )(x2, scale_rows)

    return out2.reshape(x.shape)


def _drop_path_reference(x, drop_prob: float, *, training: bool, key=None):
    """Pure-JAX mirror of the PyTorch code (same per-sample random draw as the kernel)."""
    if drop_prob == 0.0 or not training:
        return x
    keep_prob = 1.0 - drop_prob
    shape = (x.shape[0],) + (1,) * (x.ndim - 1)
    u = jax.random.uniform(key, (x.shape[0],), dtype=jnp.float32)
    mask = jnp.floor(keep_prob + u).reshape(shape).astype(x.dtype)
    return (x / keep_prob) * mask


if __name__ == "__main__":
    root = jax.random.PRNGKey(0)
    drop_prob = 0.25

    cases = [
        # (shape, dtype, byte_budget override)
        ((2, 4, 16, 16), jnp.float32, None),        # base shape; N=2 folds to 8 rows
        ((10, 4, 16, 16), jnp.float32, None),       # N not a multiple of 8; folds to 40 rows
        ((2, 3, 5, 7), jnp.float32, None),          # ragged D; full-dim blocks
        ((4, 8, 16, 16), jnp.bfloat16, None),       # bf16: 16-row sublane packing
        ((10, 4, 16, 16), jnp.float32, 4096),       # tiny budget -> multi-step 2-D grid
        ((8, 4, 32, 32, 32), jnp.float32, None),    # video-sized; exercises megacore split
    ]

    for idx, (shape, dtype, budget) in enumerate(cases):
        k_x, k_mask = jax.random.split(jax.random.fold_in(root, idx))
        x = jax.random.normal(k_x, shape, dtype=jnp.float32).astype(dtype)

        kwargs = {} if budget is None else {"byte_budget": budget}
        y = drop_path(x, drop_prob, training=True, key=k_mask, **kwargs)
        y = jax.block_until_ready(y)
        y_ref = _drop_path_reference(x, drop_prob, training=True, key=k_mask)

        assert y.shape == x.shape and y.dtype == x.dtype
        atol, rtol = (1e-6, 1e-5) if dtype == jnp.float32 else (2e-2, 2e-2)
        assert jnp.allclose(y.astype(jnp.float32), y_ref.astype(jnp.float32),
                            atol=atol, rtol=rtol)

        # Eval / zero-prob paths are identity (matches the torch early-return).
        assert drop_path(x, drop_prob, training=False) is x
        assert drop_path(x, 0.0, training=True, key=k_mask) is x

    print("KERNEL_OK")
</pallas_src>

<mosaic_0001>
module attributes {stable_mosaic.version = 11 : i64} {
  func.func @_drop_path_kernel(%arg0: i32, %arg1: i32, %arg2: memref<8x256xf32, #tpu.memory_space<vmem>>, %arg3: memref<8x1xf32, #tpu.memory_space<vmem>>, %arg4: memref<8x256xf32, #tpu.memory_space<vmem>>) attributes {dimension_semantics = [#tpu.dimension_semantics<parallel>, #tpu.dimension_semantics<parallel>], iteration_bounds = array<i64: 1, 1>, scalar_prefetch = 0 : i64, scratch_operands = 0 : i64, tpu.core_type = #tpu.core_type<tc>, window_params = [{transform_indices = @transform_0, window_bounds = array<i64: 8, 256>}, {transform_indices = @transform_1, window_bounds = array<i64: 8, 1>}, {transform_indices = @transform_2, window_bounds = array<i64: 8, 256>}]} {
    %c0 = arith.constant 0 : index
    %c0_0 = arith.constant 0 : index
    %0 = vector.load %arg2[%c0, %c0_0] : memref<8x256xf32, #tpu.memory_space<vmem>>, vector<8x256xf32>
    %c0_1 = arith.constant 0 : index
    %c0_2 = arith.constant 0 : index
    %1 = vector.load %arg3[%c0_1, %c0_2] : memref<8x1xf32, #tpu.memory_space<vmem>>, vector<8x1xf32>
    %2 = vector.broadcast %1 : vector<8x1xf32> to vector<8x256xf32>
    %3 = arith.mulf %0, %2 : vector<8x256xf32>
    %c0_3 = arith.constant 0 : index
    %c0_4 = arith.constant 0 : index
    %4 = vector.load %arg4[%c0_3, %c0_4] : memref<8x256xf32, #tpu.memory_space<vmem>>, vector<8x256xf32>
    tpu.vector_store %arg4[%c0_3, %c0_4], %3 {strides = array<i32>} : memref<8x256xf32, #tpu.memory_space<vmem>>, vector<8x256xf32>,
    return
  }
  func.func @transform_0(%arg0: i32, %arg1: i32) -> (i32, i32) {
    %c0_i32 = arith.constant 0 : i32
    return %arg0, %arg1 : i32, i32
  }
  func.func @transform_1(%arg0: i32, %arg1: i32) -> (i32, i32) {
    %c0_i32 = arith.constant 0 : i32
    %c0_i32_0 = arith.constant 0 : i32
    return %arg0, %c0_i32 : i32, i32
  }
  func.func @transform_2(%arg0: i32, %arg1: i32) -> (i32, i32) {
    %c0_i32 = arith.constant 0 : i32
    return %arg0, %arg1 : i32, i32
  }
}

</mosaic_0001>

<bundles_post_ra>
// kernel: tpu_custom_call.1
= control target key start
LH: loop header
LB: loop body
LE: loop exit
PB: predicated region body
PF: predicated region fallthrough
CT: control target
= control target key end

     0   :  { %7 = vsyncpa [#allocation3], 0  ;;  %s138_s0 = inlined_call_operand.hbm [shape: f32[8,256], index: 0, kind: input, shape index: {}]   ;;  %s139_s1 = inlined_call_operand.vmem [shape: f32[8,1], index: 1, kind: input, shape index: {}]   ;;  %s140_s2 = inlined_call_operand.hbm [shape: f32[8,256], index: 2, kind: output, shape index: {}]  }
   0x1   :  { %8 = vsyncpa [#allocation4], 0  ;;  %s14_s11 = sshll.u32 %s138_s0, 4  ;;  %s111_s12 = smov [#allocation2]   ;;  %s15_s11 = int_to_ptr.hbm [resolvable:$true] %s14_s11 }
   0x2   :  { %s16_s13 = sshll.u32 %s111_s12, 4  ;;  %s17_s13 = int_to_ptr.vmem [resolvable:$true] %s16_s13 }
   0x3   :  { %19 = dma.hbm_to_vmem [thread:$0]  %s15_s11, 256, %s17_s13, [#allocation3]  }
   0x4   :  { %107 = dma.done.wait [#allocation3], 256  }
   0x5   :  { %108 = vsyncadd [#allocation3], 4294967040  ;;  %v112_v0 = vmov 0   ;;  %v28_v1 = vld [vmem:[%s139_s1] sm:$0xff]  ;;  %v27_v3 = vld [vmem:[#allocation2 + $0x8] sm:$0xff]  ;;  %s113_s16 = smov [#allocation5]  }
   0x6   :  { %58 = vset.pattern.permute.xlu0 %v112_v0  ;;  %v26_v2 = vld [vmem:[#allocation2] sm:$0xff]  ;;  %s43_s17 = sshll.u32 %s113_s16, 4  ;;  %s45_s19 = sshll.u32 %s140_s2, 4  ;;  %s44_s17 = int_to_ptr.vmem [resolvable:$true] %s43_s17  ;;  %s46_s19 = int_to_ptr.hbm [resolvable:$true] %s45_s19 }
   0x7   :  { %31 = vperm.xlu0 %58, %v28_v1  }
  0x79   :  { %v32_v4 = vpop.permute.xlu0 %31 }
  0x7a   :  { %v34_v5 = vmul.f32 %v32_v4, %v26_v2  ;;  %v35_v6 = vmul.f32 %v32_v4, %v27_v3 }
  0x7c   :  { %36 = vst [vmem:[#allocation5] sm:$0xff] %v34_v5 }
  0x7d   :  { %37 = vst [vmem:[#allocation5 + $0x8] sm:$0xff] %v35_v6 }
  0x7e   :  { %48 = dma.vmem_to_hbm [thread:$0]  %s44_s17, 256, %s46_s19, [#allocation4]  }
  0x7f   :  { %109 = dma.done.wait [#allocation4], 256  }
  0x80   :  { %110 = vsyncadd [#allocation4], 4294967040 }
  0x81   :  { %53 = vsyncpa [#allocation3], 1 }
  0x82   :  { %54 = vsyncpa [#allocation4], 1 }

</bundles_post_ra>
